<compile_context>
chip_gen: v6e
topology: v6e:2x2x1
jax: 0.10.0
libtpu: 0.0.40
codegen_flags: <defaults>
</compile_context>

<pallas_src>
import jax
import jax.numpy as jnp
from jax.experimental import pallas as pl
from jax.experimental.pallas import tpu as pltpu

_LANE = 128


def _outconv_kernel(w_ref, b_ref, x_ref, o_ref):
    # w_ref: SMEM (C_out, C_in) f32        b_ref: SMEM (C_out,) f32
    # x_ref: VMEM (1, C_in, tile_r, 128)   o_ref: VMEM (1, C_out, tile_r, 128)
    c_out, c_in = w_ref.shape
    for co in range(c_out):                      # static unroll (C_out tiny)
        acc = x_ref[0, 0].astype(jnp.float32) * w_ref[co, 0]
        for ci in range(1, c_in):                # static unroll (C_in tiny)
            acc = acc + x_ref[0, ci].astype(jnp.float32) * w_ref[co, ci]
        o_ref[0, co] = (acc + b_ref[co]).astype(o_ref.dtype)


def out_conv(x, weight, bias, *, tile_rows=512):
    """1x1 convolution (NCHW in/out), equivalent to nn.Conv2d(C_in, C_out, 1)."""
    N, C_in, H, W = x.shape
    C_out = weight.shape[0]
    S = H * W

    # Parameters as f32 scalars for SMEM.
    w_mat = weight.reshape(C_out, C_in).astype(jnp.float32)
    b_vec = bias.reshape(C_out).astype(jnp.float32)

    # Spatial tiling: s -> (rows, 128). Pick the tile along `rows`.
    rows = pl.cdiv(S, _LANE)
    if rows <= tile_rows:
        tile_r = rows                              # whole spatial in one block
        rows_pad = rows
    else:
        tile_r = max(8, (tile_rows // 8) * 8)      # sublane-aligned tile
        rows_pad = pl.cdiv(rows, tile_r) * tile_r
    S_pad = rows_pad * _LANE

    x3 = x.reshape(N, C_in, S)
    if S_pad != S:
        x3 = jnp.pad(x3, ((0, 0), (0, 0), (0, S_pad - S)))
    x4 = x3.reshape(N, C_in, rows_pad, _LANE)      # free reshape (contiguous)

    grid = (N, rows_pad // tile_r)

    y4 = pl.pallas_call(
        _outconv_kernel,
        out_shape=jax.ShapeDtypeStruct((N, C_out, rows_pad, _LANE), x.dtype),
        grid=grid,
        in_specs=[
            pl.BlockSpec(memory_space=pltpu.MemorySpace.SMEM),          # weight
            pl.BlockSpec(memory_space=pltpu.MemorySpace.SMEM),          # bias
            pl.BlockSpec((1, C_in, tile_r, _LANE), lambda n, s: (n, 0, s, 0)),
        ],
        out_specs=pl.BlockSpec((1, C_out, tile_r, _LANE), lambda n, s: (n, 0, s, 0)),
        compiler_params=pltpu.CompilerParams(
            dimension_semantics=("parallel", "parallel"),
            vmem_limit_bytes=32 * 1024 * 1024,     # explicit; tiles stay far below
        ),
    )(w_mat, b_vec, x4)

    y3 = y4.reshape(N, C_out, S_pad)
    if S_pad != S:
        y3 = y3[:, :, :S]
    return y3.reshape(N, C_out, H, W)


if __name__ == "__main__":
    key = jax.random.PRNGKey(0)
    k_x, k_w, k_b = jax.random.split(key, 3)

    # Small shapes consistent with OutConv(in_channels=4, out_channels=3)
    batch, in_channels, out_channels, spatial = 2, 4, 3, 16

    x = jax.random.normal(k_x, (batch, in_channels, spatial, spatial), jnp.float32)
    # Conv2d weight shape: (C_out, C_in, 1, 1)
    bound = 1.0 / jnp.sqrt(in_channels)
    weight = jax.random.uniform(k_w, (out_channels, in_channels, 1, 1),
                                jnp.float32, -bound, bound)
    bias = jax.random.uniform(k_b, (out_channels,), jnp.float32, -bound, bound)

    y = out_conv(x, weight, bias)
    y = jax.block_until_ready(y)

    # Pure-JAX reference: 1x1 conv == channel-wise matmul + bias
    y_ref = jnp.einsum("nchw,oc->nohw", x, weight.reshape(out_channels, in_channels))
    y_ref = y_ref + bias.reshape(1, out_channels, 1, 1)
    assert y.shape == (batch, out_channels, spatial, spatial)
    assert jnp.allclose(y, y_ref, atol=1e-5, rtol=1e-5)

    print("KERNEL_OK")
</pallas_src>

<mosaic_0001>
module attributes {stable_mosaic.version = 11 : i64} {
  func.func @_outconv_kernel(%arg0: i32, %arg1: i32, %arg2: memref<3x4xf32, #tpu.memory_space<smem>>, %arg3: memref<3xf32, #tpu.memory_space<smem>>, %arg4: memref<1x4x2x128xf32, #tpu.memory_space<vmem>>, %arg5: memref<1x3x2x128xf32, #tpu.memory_space<vmem>>) attributes {dimension_semantics = [#tpu.dimension_semantics<parallel>, #tpu.dimension_semantics<parallel>], iteration_bounds = array<i64: 2, 1>, scalar_prefetch = 0 : i64, scratch_operands = 0 : i64, tpu.core_type = #tpu.core_type<tc>, window_params = [{transform_indices = @transform_0, window_bounds = array<i64: 3, 4>}, {transform_indices = @transform_1, window_bounds = array<i64: 3>}, {transform_indices = @transform_2, window_bounds = array<i64: 1, 4, 2, 128>}, {transform_indices = @transform_3, window_bounds = array<i64: 1, 3, 2, 128>}]} {
    %c0 = arith.constant 0 : index
    %c0_0 = arith.constant 0 : index
    %c0_1 = arith.constant 0 : index
    %c0_2 = arith.constant 0 : index
    %0 = vector.load %arg4[%c0, %c0_0, %c0_1, %c0_2] : memref<1x4x2x128xf32, #tpu.memory_space<vmem>>, vector<1x1x2x128xf32>
    %1 = vector.shape_cast %0 : vector<1x1x2x128xf32> to vector<2x128xf32>
    %c0_3 = arith.constant 0 : index
    %c0_4 = arith.constant 0 : index
    %2 = memref.load %arg2[%c0_3, %c0_4] : memref<3x4xf32, #tpu.memory_space<smem>>
    %3 = vector.broadcast %2 : f32 to vector<2x128xf32>
    %4 = arith.mulf %1, %3 : vector<2x128xf32>
    %c0_5 = arith.constant 0 : index
    %c1 = arith.constant 1 : index
    %c0_6 = arith.constant 0 : index
    %c0_7 = arith.constant 0 : index
    %5 = vector.load %arg4[%c0_5, %c1, %c0_6, %c0_7] : memref<1x4x2x128xf32, #tpu.memory_space<vmem>>, vector<1x1x2x128xf32>
    %6 = vector.shape_cast %5 : vector<1x1x2x128xf32> to vector<2x128xf32>
    %c0_8 = arith.constant 0 : index
    %c1_9 = arith.constant 1 : index
    %7 = memref.load %arg2[%c0_8, %c1_9] : memref<3x4xf32, #tpu.memory_space<smem>>
    %8 = vector.broadcast %7 : f32 to vector<2x128xf32>
    %9 = arith.mulf %6, %8 : vector<2x128xf32>
    %10 = arith.addf %4, %9 : vector<2x128xf32>
    %c0_10 = arith.constant 0 : index
    %c2 = arith.constant 2 : index
    %c0_11 = arith.constant 0 : index
    %c0_12 = arith.constant 0 : index
    %11 = vector.load %arg4[%c0_10, %c2, %c0_11, %c0_12] : memref<1x4x2x128xf32, #tpu.memory_space<vmem>>, vector<1x1x2x128xf32>
    %12 = vector.shape_cast %11 : vector<1x1x2x128xf32> to vector<2x128xf32>
    %c0_13 = arith.constant 0 : index
    %c2_14 = arith.constant 2 : index
    %13 = memref.load %arg2[%c0_13, %c2_14] : memref<3x4xf32, #tpu.memory_space<smem>>
    %14 = vector.broadcast %13 : f32 to vector<2x128xf32>
    %15 = arith.mulf %12, %14 : vector<2x128xf32>
    %16 = arith.addf %10, %15 : vector<2x128xf32>
    %c0_15 = arith.constant 0 : index
    %c3 = arith.constant 3 : index
    %c0_16 = arith.constant 0 : index
    %c0_17 = arith.constant 0 : index
    %17 = vector.load %arg4[%c0_15, %c3, %c0_16, %c0_17] : memref<1x4x2x128xf32, #tpu.memory_space<vmem>>, vector<1x1x2x128xf32>
    %18 = vector.shape_cast %17 : vector<1x1x2x128xf32> to vector<2x128xf32>
    %c0_18 = arith.constant 0 : index
    %c3_19 = arith.constant 3 : index
    %19 = memref.load %arg2[%c0_18, %c3_19] : memref<3x4xf32, #tpu.memory_space<smem>>
    %20 = vector.broadcast %19 : f32 to vector<2x128xf32>
    %21 = arith.mulf %18, %20 : vector<2x128xf32>
    %22 = arith.addf %16, %21 : vector<2x128xf32>
    %c0_20 = arith.constant 0 : index
    %23 = memref.load %arg3[%c0_20] : memref<3xf32, #tpu.memory_space<smem>>
    %24 = vector.broadcast %23 : f32 to vector<2x128xf32>
    %25 = arith.addf %22, %24 : vector<2x128xf32>
    %c0_21 = arith.constant 0 : index
    %c0_22 = arith.constant 0 : index
    %c0_23 = arith.constant 0 : index
    %c0_24 = arith.constant 0 : index
    %26 = vector.load %arg5[%c0_21, %c0_22, %c0_23, %c0_24] : memref<1x3x2x128xf32, #tpu.memory_space<vmem>>, vector<1x1x2x128xf32>
    %27 = vector.shape_cast %26 : vector<1x1x2x128xf32> to vector<2x128xf32>
    %28 = vector.shape_cast %25 : vector<2x128xf32> to vector<1x1x2x128xf32>
    tpu.vector_store %arg5[%c0_21, %c0_22, %c0_23, %c0_24], %28 {strides = array<i32>} : memref<1x3x2x128xf32, #tpu.memory_space<vmem>>, vector<1x1x2x128xf32>,
    %c0_25 = arith.constant 0 : index
    %c0_26 = arith.constant 0 : index
    %c0_27 = arith.constant 0 : index
    %c0_28 = arith.constant 0 : index
    %29 = vector.load %arg4[%c0_25, %c0_26, %c0_27, %c0_28] : memref<1x4x2x128xf32, #tpu.memory_space<vmem>>, vector<1x1x2x128xf32>
    %30 = vector.shape_cast %29 : vector<1x1x2x128xf32> to vector<2x128xf32>
    %c1_29 = arith.constant 1 : index
    %c0_30 = arith.constant 0 : index
    %31 = memref.load %arg2[%c1_29, %c0_30] : memref<3x4xf32, #tpu.memory_space<smem>>
    %32 = vector.broadcast %31 : f32 to vector<2x128xf32>
    %33 = arith.mulf %30, %32 : vector<2x128xf32>
    %c0_31 = arith.constant 0 : index
    %c1_32 = arith.constant 1 : index
    %c0_33 = arith.constant 0 : index
    %c0_34 = arith.constant 0 : index
    %34 = vector.load %arg4[%c0_31, %c1_32, %c0_33, %c0_34] : memref<1x4x2x128xf32, #tpu.memory_space<vmem>>, vector<1x1x2x128xf32>
    %35 = vector.shape_cast %34 : vector<1x1x2x128xf32> to vector<2x128xf32>
    %c1_35 = arith.constant 1 : index
    %c1_36 = arith.constant 1 : index
    %36 = memref.load %arg2[%c1_35, %c1_36] : memref<3x4xf32, #tpu.memory_space<smem>>
    %37 = vector.broadcast %36 : f32 to vector<2x128xf32>
    %38 = arith.mulf %35, %37 : vector<2x128xf32>
    %39 = arith.addf %33, %38 : vector<2x128xf32>
    %c0_37 = arith.constant 0 : index
    %c2_38 = arith.constant 2 : index
    %c0_39 = arith.constant 0 : index
    %c0_40 = arith.constant 0 : index
    %40 = vector.load %arg4[%c0_37, %c2_38, %c0_39, %c0_40] : memref<1x4x2x128xf32, #tpu.memory_space<vmem>>, vector<1x1x2x128xf32>
    %41 = vector.shape_cast %40 : vector<1x1x2x128xf32> to vector<2x128xf32>
    %c1_41 = arith.constant 1 : index
    %c2_42 = arith.constant 2 : index
    %42 = memref.load %arg2[%c1_41, %c2_42] : memref<3x4xf32, #tpu.memory_space<smem>>
    %43 = vector.broadcast %42 : f32 to vector<2x128xf32>
    %44 = arith.mulf %41, %43 : vector<2x128xf32>
    %45 = arith.addf %39, %44 : vector<2x128xf32>
    %c0_43 = arith.constant 0 : index
    %c3_44 = arith.constant 3 : index
    %c0_45 = arith.constant 0 : index
    %c0_46 = arith.constant 0 : index
    %46 = vector.load %arg4[%c0_43, %c3_44, %c0_45, %c0_46] : memref<1x4x2x128xf32, #tpu.memory_space<vmem>>, vector<1x1x2x128xf32>
    %47 = vector.shape_cast %46 : vector<1x1x2x128xf32> to vector<2x128xf32>
    %c1_47 = arith.constant 1 : index
    %c3_48 = arith.constant 3 : index
    %48 = memref.load %arg2[%c1_47, %c3_48] : memref<3x4xf32, #tpu.memory_space<smem>>
    %49 = vector.broadcast %48 : f32 to vector<2x128xf32>
    %50 = arith.mulf %47, %49 : vector<2x128xf32>
    %51 = arith.addf %45, %50 : vector<2x128xf32>
    %c1_49 = arith.constant 1 : index
    %52 = memref.load %arg3[%c1_49] : memref<3xf32, #tpu.memory_space<smem>>
    %53 = vector.broadcast %52 : f32 to vector<2x128xf32>
    %54 = arith.addf %51, %53 : vector<2x128xf32>
    %c0_50 = arith.constant 0 : index
    %c1_51 = arith.constant 1 : index
    %c0_52 = arith.constant 0 : index
    %c0_53 = arith.constant 0 : index
    %55 = vector.load %arg5[%c0_50, %c1_51, %c0_52, %c0_53] : memref<1x3x2x128xf32, #tpu.memory_space<vmem>>, vector<1x1x2x128xf32>
    %56 = vector.shape_cast %55 : vector<1x1x2x128xf32> to vector<2x128xf32>
    %57 = vector.shape_cast %54 : vector<2x128xf32> to vector<1x1x2x128xf32>
    tpu.vector_store %arg5[%c0_50, %c1_51, %c0_52, %c0_53], %57 {strides = array<i32>} : memref<1x3x2x128xf32, #tpu.memory_space<vmem>>, vector<1x1x2x128xf32>,
    %c0_54 = arith.constant 0 : index
    %c0_55 = arith.constant 0 : index
    %c0_56 = arith.constant 0 : index
    %c0_57 = arith.constant 0 : index
    %58 = vector.load %arg4[%c0_54, %c0_55, %c0_56, %c0_57] : memref<1x4x2x128xf32, #tpu.memory_space<vmem>>, vector<1x1x2x128xf32>
    %59 = vector.shape_cast %58 : vector<1x1x2x128xf32> to vector<2x128xf32>
    %c2_58 = arith.constant 2 : index
    %c0_59 = arith.constant 0 : index
    %60 = memref.load %arg2[%c2_58, %c0_59] : memref<3x4xf32, #tpu.memory_space<smem>>
    %61 = vector.broadcast %60 : f32 to vector<2x128xf32>
    %62 = arith.mulf %59, %61 : vector<2x128xf32>
    %c0_60 = arith.constant 0 : index
    %c1_61 = arith.constant 1 : index
    %c0_62 = arith.constant 0 : index
    %c0_63 = arith.constant 0 : index
    %63 = vector.load %arg4[%c0_60, %c1_61, %c0_62, %c0_63] : memref<1x4x2x128xf32, #tpu.memory_space<vmem>>, vector<1x1x2x128xf32>
    %64 = vector.shape_cast %63 : vector<1x1x2x128xf32> to vector<2x128xf32>
    %c2_64 = arith.constant 2 : index
    %c1_65 = arith.constant 1 : index
    %65 = memref.load %arg2[%c2_64, %c1_65] : memref<3x4xf32, #tpu.memory_space<smem>>
    %66 = vector.broadcast %65 : f32 to vector<2x128xf32>
    %67 = arith.mulf %64, %66 : vector<2x128xf32>
    %68 = arith.addf %62, %67 : vector<2x128xf32>
    %c0_66 = arith.constant 0 : index
    %c2_67 = arith.constant 2 : index
    %c0_68 = arith.constant 0 : index
    %c0_69 = arith.constant 0 : index
    %69 = vector.load %arg4[%c0_66, %c2_67, %c0_68, %c0_69] : memref<1x4x2x128xf32, #tpu.memory_space<vmem>>, vector<1x1x2x128xf32>
    %70 = vector.shape_cast %69 : vector<1x1x2x128xf32> to vector<2x128xf32>
    %c2_70 = arith.constant 2 : index
    %c2_71 = arith.constant 2 : index
    %71 = memref.load %arg2[%c2_70, %c2_71] : memref<3x4xf32, #tpu.memory_space<smem>>
    %72 = vector.broadcast %71 : f32 to vector<2x128xf32>
    %73 = arith.mulf %70, %72 : vector<2x128xf32>
    %74 = arith.addf %68, %73 : vector<2x128xf32>
    %c0_72 = arith.constant 0 : index
    %c3_73 = arith.constant 3 : index
    %c0_74 = arith.constant 0 : index
    %c0_75 = arith.constant 0 : index
    %75 = vector.load %arg4[%c0_72, %c3_73, %c0_74, %c0_75] : memref<1x4x2x128xf32, #tpu.memory_space<vmem>>, vector<1x1x2x128xf32>
    %76 = vector.shape_cast %75 : vector<1x1x2x128xf32> to vector<2x128xf32>
    %c2_76 = arith.constant 2 : index
    %c3_77 = arith.constant 3 : index
    %77 = memref.load %arg2[%c2_76, %c3_77] : memref<3x4xf32, #tpu.memory_space<smem>>
    %78 = vector.broadcast %77 : f32 to vector<2x128xf32>
    %79 = arith.mulf %76, %78 : vector<2x128xf32>
    %80 = arith.addf %74, %79 : vector<2x128xf32>
    %c2_78 = arith.constant 2 : index
    %81 = memref.load %arg3[%c2_78] : memref<3xf32, #tpu.memory_space<smem>>
    %82 = vector.broadcast %81 : f32 to vector<2x128xf32>
    %83 = arith.addf %80, %82 : vector<2x128xf32>
    %c0_79 = arith.constant 0 : index
    %c2_80 = arith.constant 2 : index
    %c0_81 = arith.constant 0 : index
    %c0_82 = arith.constant 0 : index
    %84 = vector.load %arg5[%c0_79, %c2_80, %c0_81, %c0_82] : memref<1x3x2x128xf32, #tpu.memory_space<vmem>>, vector<1x1x2x128xf32>
    %85 = vector.shape_cast %84 : vector<1x1x2x128xf32> to vector<2x128xf32>
    %86 = vector.shape_cast %83 : vector<2x128xf32> to vector<1x1x2x128xf32>
    tpu.vector_store %arg5[%c0_79, %c2_80, %c0_81, %c0_82], %86 {strides = array<i32>} : memref<1x3x2x128xf32, #tpu.memory_space<vmem>>, vector<1x1x2x128xf32>,
    return
  }
  func.func @transform_0(%arg0: i32, %arg1: i32) -> (i32, i32) {
    %c0_i32 = arith.constant 0 : i32
    %c0_i32_0 = arith.constant 0 : i32
    %c0_i32_1 = arith.constant 0 : i32
    return %c0_i32, %c0_i32_0 : i32, i32
  }
  func.func @transform_1(%arg0: i32, %arg1: i32) -> i32 {
    %c0_i32 = arith.constant 0 : i32
    %c0_i32_0 = arith.constant 0 : i32
    return %c0_i32 : i32
  }
  func.func @transform_2(%arg0: i32, %arg1: i32) -> (i32, i32, i32, i32) {
    %c0_i32 = arith.constant 0 : i32
    %c0_i32_0 = arith.constant 0 : i32
    %c0_i32_1 = arith.constant 0 : i32
    return %arg0, %c0_i32, %arg1, %c0_i32_0 : i32, i32, i32, i32
  }
  func.func @transform_3(%arg0: i32, %arg1: i32) -> (i32, i32, i32, i32) {
    %c0_i32 = arith.constant 0 : i32
    %c0_i32_0 = arith.constant 0 : i32
    %c0_i32_1 = arith.constant 0 : i32
    return %arg0, %c0_i32, %arg1, %c0_i32_0 : i32, i32, i32, i32
  }
}

</mosaic_0001>

<bundles_post_ra>
// kernel: tpu_custom_call.1
= control target key start
LH: loop header
LB: loop body
LE: loop exit
PB: predicated region body
PF: predicated region fallthrough
CT: control target
= control target key end

     0   :  { %s932_s0 = inlined_call_operand.hbm [shape: f32[3,4], index: 0, kind: input, shape index: {}]   ;;  %s933_s1 = inlined_call_operand.vmem [shape: f32[3], index: 1, kind: input, shape index: {}]   ;;  %s934_s2 = inlined_call_operand.hbm [shape: f32[2,4,2,128], index: 2, kind: input, shape index: {}]   ;;  %s935_s3 = inlined_call_operand.hbm [shape: f32[2,3,2,128], index: 3, kind: output, shape index: {}]  }
   0x1   :  { %937 = sst [smem:[#allocation14_spill]] %s932_s0 }
   0x2   :  { %8 = vsyncpa [#allocation5], 0 }
   0x3   :  { %9 = vsyncpa [#allocation6], 0 }
   0x4   :  { %10 = vsyncpa [#allocation3], 0 }
   0x5   :  { %12 = vsyncpa [#allocation3 + $0x1], 0 }
   0x6   :  { %13 = vsyncpa [#allocation4], 0 }
   0x7   :  { %15 = vsyncpa [#allocation4 + $0x1], 0  ;;  %s731_s12 = smov 0   ;;  %s733_s13 = smov 0  }
   0x8   :  { %s735_s14 = smov 0   ;;  %s737_s15 = smov 0  }
   0x9   :  { %s739_s16 = smov 0   ;;  %s741_s17 = smov 0  }
   0xa LB: > { %s429_s18 = sadd.s32 4294967295, %s701_s17   ;;  %s430_s19 = sadd.s32 4294967294, %s701_s17   ;;  %s701_s17 = sphi %s741_s17, %s21_s17   ;;  %s697_s16 = sphi %s739_s16, %s953_s16   ;;  %s693_s15 = sphi %s737_s15, %s952_s15   ;;  %s689_s14 = sphi %s735_s14, %s951_s14   ;;  %s685_s13 = sphi %s733_s13, %s950_s13   ;;  %s681_s12 = sphi %s731_s12, %s949_s12  }
   0xb   : > { %s84_s20 = sadd.s32 1, %s689_s14  ;;  %p91_p0 = scmp.ne.s32.totalorder %s689_s14, %s685_s13 }
   0xc   : > { %p92_p1 = scmp.eq.s32.totalorder %s701_s17, 0  ;;  %p97_p2 = scmp.ne.s32.totalorder %s685_s13, %s681_s12 }
   0xd   : > { %p769_p3 = scmp.eq.s32.totalorder %s429_s18, 0  ;;  %p123_p4 = scmp.eq.s32.totalorder %s429_s18, 1 }
   0xe   : > { %p93_p5 = por %p92_p1, %p91_p0  ;;  %p129_p6 = scmp.eq.s32.totalorder %s430_s19, 1 }
   0xf   : > { %p775_p7 = por %p769_p3, %p97_p2  ;;  %p779_p8 = por %p123_p4, %p91_p0 }
  0x10   : > { %p783_p9 = por %p129_p6, %p97_p2  ;;  %p431_p10 = scmp.ge.s32.totalorder %s701_s17, 1 }
  0x11   : > { %s940_s23 = scalar_select %p779_p8, 1, 0 }
  0x12   : > { %s941_s24 = scalar_select %p783_p9, 1, 0 }
  0x13   : > { %p136_p11 = scmp.lt.s32.totalorder %s701_s17, 3  ;;  %p501_p1 = scmp.lt.s32.totalorder %s701_s17, 2 }
  0x14   : > { %s158_s28 = sshll.u32 %s933_s1, 4  ;;  %s169_s4 = sand.u32 1, %s689_s14   ;;  %s159_s28 = int_to_ptr.vmem [resolvable:$true] %s158_s28 }
  0x15   : > { %p790_p13 = pnand %p431_p10, %p136_p11  ;;  %p800_p4 = pnand %p501_p1, %p93_p5 }
  0x16   : > { %s33_s5 = sadd.s32 1, %s697_s16  ;;  %s703_s6 = smov [#allocation2]  }
  0x17   : > { %p484_p0 = pneg %p790_p13  ;;  %s945_s0 = sld [smem:[#allocation14_spill]] }
  0x18   : > { %s570_s9 = scalar_lea.vmem %s159_s28, 16  ;;  %p578_p1 = scmp.lt.s32.totalorder %s159_s28, %s159_s28 }
  0x19   : > { %p806_p2 = pnand %p484_p0, %p769_p3  ;;  %p571_p5 = scmp.ne.s32.totalorder %s159_s28, %s570_s9 }
  0x1a   : > { %p579_p0 = scmp.lt.s32.totalorder %s570_s9, %s570_s9 }
  0x1b   : > { %p572_p6 = pneg %p806_p2 }
  0x1c   : > { %p580_p12 = por %p579_p0, %p578_p1 }
  0x1d   : > { %487 = dma.hbm_to_smem (!%p806_p2), %s945_s0, 64, %s703_s6, [#allocation5]  }
  0x1e   : > { %p573_p10 = pnand %p572_p6, %p571_p5 }
  0x20   : > { %p574_p11 = pneg %p573_p10 }
  0x22   : > { %p581_p9 = pnand %p580_p12, %p574_p11 }
  0x24   : > { %584 = shalt.err (!%p581_p9)
}
  0x25   : > { %s704_s10 = smov [#allocation7]   ;;  %p35_p8 = scmp.ge.s32.totalorder %s33_s5, 2 }
  0x26   : > { %490 = dma.vmem_to_smem (!%p806_p2), %s159_s28, 16, %s704_s10, [#allocation6]  }
  0x27   : > { %s435_s11 = sshll.u32 %s169_s4, 3  ;;  %s469_s18 = sshll.u32 %s697_s16, 7 }
  0x28   : > { %s955_s5 = smov (%p35_p8, %s33_s5), 0  ;;  %s180_s27 = scalar_lea.hbm %s934_s2, %s469_s18 }
  0x29   : > { %s79_s6 = ssub.s32 %s697_s16, %s955_s5  ;;  %s173_s7 = scalar_lea.vmem [#allocation8], %s435_s11 }
  0x2a   : > { %s181_s8 = sshll.u32 %s173_s7, 4  ;;  %p82_p9 = scmp.eq.s32.totalorder %s79_s6, 0  ;;  %s182_s8 = int_to_ptr.vmem [resolvable:$true] %s181_s8 }
  0x2b   : > { %s170_s9 = scalar_lea.sflag [#allocation3], %s169_s4  ;;  %p587_p12 = pneg %p800_p4 }
  0x2c   : > { %s832_s30 = scalar_select %p82_p9, %s689_s14, %s84_s20  }
  0x2d   : > { %s598_s28 = scalar_lea.vmem %s182_s8, 128  ;;  %s705_s10 = smov [#allocation8]  }
  0x2e   : > { %p599_p2 = scmp.ne.s32.totalorder %s182_s8, %s598_s28  ;;  %s603_s0 = sshll.u32 %s705_s10, 4  ;;  %s604_s0 = int_to_ptr.vmem [resolvable:$false] %s603_s0 }
  0x2f   : > { %s605_s19 = scalar_lea.vmem %s604_s0, 256  ;;  %p606_p6 = scmp.lt.s32.totalorder %s182_s8, %s604_s0 }
  0x30   : > { %p601_p8 = pnand %p599_p2, %p587_p12  ;;  %p607_p10 = scmp.lt.s32.totalorder %s605_s19, %s598_s28 }
  0x32   : > { %p602_p5 = pneg %p601_p8  ;;  %p608_p11 = por %p607_p10, %p606_p6 }
  0x34   : > { %p609_p1 = pnand %p608_p11, %p602_p5 }
  0x36   : > { %612 = shalt.err (!%p609_p1)
}
  0x37   : > { %s706_s11 = smov 32   ;;  %s707_s20 = smov 2  }
  0x38   : > { %494 = dma.hbm_to_vmem [thread:$0]  (!%p800_p4), %s180_s27, 128, %s182_s8, %s170_s9, %s706_s11, %s706_s11, %s707_s20  }
  0x39   : > { %193 = sbr.rel (%p790_p13) target bundleno = 113 (0x71), region = 32 }
  0x3e   : > { %664 = dma.done.wait (%p769_p3), [#allocation5], 64  }
  0x3f   : > { %666 = vsyncadd (%p769_p3), [#allocation5], 4294967232 }
  0x40   : > { %668 = dma.done.wait (%p769_p3), [#allocation6], 16  }
  0x41   : > { %670 = vsyncadd (%p769_p3), [#allocation6], 4294967280  ;;  %s849_s0 = sand.u32 1, %s685_s13  }
  0x42   : > { %s441_s25 = sshll.u32 %s849_s0, 3  ;;  %s204_s29 = scalar_lea.sflag [#allocation3], %s849_s0 }
  0x43   : > { %s853_s4 = scalar_lea.vmem [#allocation8], %s441_s25 }
  0x44   : > { %672 = dma.done.wait (%p775_p7), %s204_s29, 128  }
  0x45   : > { %674 = vsyncadd (%p775_p7), %s204_s29, 4294967168 }
  0x46   : > { %212 = sfence }
  0x47   : > { %s232_s18 = sld [smem:[#allocation2]]  ;;  %v231_v0 = vld [vmem:[%s853_s4] sm:$0x3]  ;;  %v442_v1 = vld [vmem:[%s853_s4 + $0x2] sm:$0x3]  ;;  %s470_s19 = smul.u32 6, %s849_s0 }
  0x48   : > { %s443_s21 = sld [smem:[#allocation2 + $0x1]]  ;;  %v444_v3 = vld [vmem:[%s853_s4 + $0x4] sm:$0x3]  ;;  %v446_v6 = vld [vmem:[%s853_s4 + $0x6] sm:$0x3]  ;;  %p946_p7 = scmp.ne.s32.totalorder %s940_s23, 0 }
  0x49   : > { %s445_s26 = sld [smem:[#allocation2 + $0x2]]  ;;  %v257_v11 = vld [vmem:[%s853_s4] sm:$0x3]  ;;  %v449_v14 = vld [vmem:[%s853_s4 + $0x2] sm:$0x3] }
  0x4a   : > { %s447_s27 = sld [smem:[#allocation2 + $0x3]]  ;;  %v451_v16 = vld [vmem:[%s853_s4 + $0x4] sm:$0x3]  ;;  %v453_v20 = vld [vmem:[%s853_s4 + $0x6] sm:$0x3] }
  0x4b   : > { %s860_s6 = sld [smem:[#allocation7]]  ;;  %v281_v27 = vld [vmem:[%s853_s4] sm:$0x3]  ;;  %v458_v30 = vld [vmem:[%s853_s4 + $0x2] sm:$0x3] }
  0x4c   : > { %s448_s7 = sld [smem:[#allocation2 + $0x80]]  ;;  %v460_v33 = vld [vmem:[%s853_s4 + $0x4] sm:$0x3]  ;;  %v462_v37 = vld [vmem:[%s853_s4 + $0x6] sm:$0x3] }
  0x4d   : > { %v233_v2 = vstv %s232_s18  ;;  %s450_s22 = sld [smem:[#allocation2 + $0x81]]  ;;  %s230_s18 = scalar_lea.vmem [#allocation9], %s470_s19 }
  0x4e   : > { %v234_v4 = vmul.f32 %v233_v2, %v231_v0  ;;  %v238_v5 = vstv %s443_s21  ;;  %s452_s8 = sld [smem:[#allocation2 + $0x82]]  ;;  %s320_s21 = sshll.u32 %s230_s18, 4  ;;  %s879_s21 = int_to_ptr.vmem [resolvable:$true] %s320_s21 }
  0x4f   : > { %v239_v7 = vmul.f32 %v442_v1, %v238_v5  ;;  %v244_v8 = vstv %s445_s26  ;;  %s454_s9 = sld [smem:[#allocation2 + $0x83]]  ;;  %s471_s26 = smul.u32 96, %s693_s15 }
  0x50   : > { %v245_v9 = vmul.f32 %v444_v3, %v244_v8  ;;  %v250_v10 = vstv %s447_s27  ;;  %s866_s28 = sld [smem:[#allocation7 + $0x1]]  ;;  %s708_s15 = smov [#allocation9]  }
  0x51   : > { %v240_v12 = vadd.f32 %v239_v7, %v234_v4  ;;  %v251_v13 = vmul.f32 %v446_v6, %v250_v10  ;;  %s457_s10 = sld [smem:[#allocation2 + $0x100]]  ;;  %v254_v21 = vstv %s860_s6  ;;  %s884_s6 = scalar_lea.hbm %s935_s3, %s471_s26 }
  0x52   : > { %v259_v15 = vstv %s448_s7  ;;  %s459_s11 = sld [smem:[#allocation2 + $0x101]]  ;;  %s306_s7 = scalar_lea.sflag [#allocation4], %s849_s0 }
  0x53   : > { %v246_v17 = vadd.f32 %v245_v9, %v240_v12  ;;  %v260_v18 = vmul.f32 %v259_v15, %v257_v11  ;;  %v263_v19 = vstv %s450_s22  ;;  %s461_s20 = sld [smem:[#allocation2 + $0x102]]  ;;  %s613_s22 = scalar_lea.vmem %s879_s21, 96 }
  0x54   : > { %v264_v22 = vmul.f32 %v449_v14, %v263_v19  ;;  %v268_v23 = vstv %s452_s8  ;;  %s463_s25 = sld [smem:[#allocation2 + $0x103]]  ;;  %p614_p3 = scmp.ne.s32.totalorder %s879_s21, %s613_s22 }
  0x55   : > { %v252_v24 = vadd.f32 %v251_v13, %v246_v17  ;;  %v269_v25 = vmul.f32 %v451_v16, %v268_v23  ;;  %v273_v26 = vstv %s454_s9  ;;  %s464_s29 = sld [smem:[#allocation7 + $0x2]]  ;;  %s617_s8 = sshll.u32 %s708_s15, 4  ;;  %s618_s8 = int_to_ptr.vmem [resolvable:$false] %s617_s8 }
  0x56   : > { %v265_v28 = vadd.f32 %v264_v22, %v260_v18  ;;  %v274_v29 = vmul.f32 %v453_v20, %v273_v26  ;;  %v277_v38 = vstv %s866_s28  ;;  %p615_p13 = pnand %p614_p3, %p946_p7  ;;  %s619_s9 = scalar_lea.vmem %s618_s8, 192 }
  0x57   : > { %v255_v31 = vadd.f32 %v254_v21, %v252_v24  ;;  %v283_v32 = vstv %s457_s10  ;;  %p620_p0 = scmp.lt.s32.totalorder %s879_s21, %s618_s8  ;;  %p621_p9 = scmp.lt.s32.totalorder %s619_s9, %s613_s22 }
  0x58   : > { %v270_v34 = vadd.f32 %v269_v25, %v265_v28  ;;  %v284_v35 = vmul.f32 %v283_v32, %v281_v27  ;;  %v287_v36 = vstv %s459_s11  ;;  %p616_p4 = pneg %p615_p13 }
  0x59   : > { %256 = vst [vmem:[%s230_s18] sm:$0x3] %v255_v31  ;;  %v288_v39 = vmul.f32 %v458_v30, %v287_v36  ;;  %v292_v40 = vstv %s461_s20  ;;  %p622_p12 = por %p621_p9, %p620_p0 }
  0x5a   : > { %v275_v41 = vadd.f32 %v274_v29, %v270_v34  ;;  %v293_v42 = vmul.f32 %v460_v33, %v292_v40  ;;  %v297_v43 = vstv %s463_s25 }
  0x5b   : > { %v289_v44 = vadd.f32 %v288_v39, %v284_v35  ;;  %v298_v45 = vmul.f32 %v462_v37, %v297_v43  ;;  %v301_v48 = vstv %s464_s29  ;;  %p623_p2 = pnand %p622_p12, %p616_p4 }
  0x5c   : > { %v278_v46 = vadd.f32 %v277_v38, %v275_v41 }
  0x5d   : > { %v294_v47 = vadd.f32 %v293_v42, %v289_v44 }
  0x5e   : > { %456 = vst [vmem:[%s230_s18 + $0x2] sm:$0x3] %v278_v46 }
  0x5f   : > { %v299_v49 = vadd.f32 %v298_v45, %v294_v47 }
  0x61   : > { %v302_v50 = vadd.f32 %v301_v48, %v299_v49 }
  0x63   : > { %465 = vst [vmem:[%s230_s18 + $0x4] sm:$0x3] %v302_v50 }
  0x64   : > { %626 = shalt.err (!%p623_p2)
}
  0x65   : > { %s627_s28 = scalar_lea.hbm %s884_s6, 96  ;;  %s631_s11 = scalar_lea.hbm %s935_s3, 192 }
  0x66   : > { %p628_p8 = scmp.ne.s32.totalorder %s884_s6, %s627_s28  ;;  %p632_p10 = scmp.lt.s32.totalorder %s884_s6, %s935_s3 }
  0x67   : > { %p633_p11 = scmp.lt.s32.totalorder %s631_s11, %s627_s28 }
  0x68   : > { %p629_p5 = pnand %p628_p8, %p946_p7 }
  0x69   : > { %p634_p1 = por %p633_p11, %p632_p10 }
  0x6a   : > { %p630_p6 = pneg %p629_p5 }
  0x6c   : > { %p635_p3 = pnand %p634_p1, %p630_p6 }
  0x6e   : > { %638 = shalt.err (!%p635_p3)
}
  0x6f   : > { %s709_s29 = smov 32   ;;  %s710_s18 = smov 2  }
  0x70   : > { %482 = dma.vmem_to_hbm [thread:$0]  (%p946_p7), %s879_s21, 96, %s884_s6, %s306_s7, %s709_s29, %s709_s29, %s710_s18  }
  0x71 PF: > { %s335_s26 = sand.u32 1, %s681_s12   ;;  %p947_p13 = scmp.ne.s32.totalorder %s941_s24, 0 }
  0x72   : > { %p948_p4 = scmp.ge.s32.totalorder %s701_s17, 2  ;;  %s336_s4 = scalar_lea.sflag [#allocation4], %s335_s26 }
  0x74   : > { %p496_p0 = pnand %p948_p4, %p947_p13 }
  0x76   : > { %p497_p9 = pneg %p496_p0 }
  0x78   : > { %676 = dma.done.wait (%p497_p9), %s336_s4, 96  }
  0x79   : > { %678 = vsyncadd (%p497_p9), %s336_s4, 4294967200  ;;  %s21_s17 = sadd.s32 1, %s701_s17   ;;  %s949_s12 = smov %s685_s13 }
  0x7a   : > { %p18_p12 = scmp.ge.s32.totalorder %s21_s17, 4   ;;  %s950_s13 = smov %s689_s14 }
  0x7b   : > { %s951_s14 = smov %s832_s30  ;;  %s952_s15 = smov %s697_s16 }
  0x7c   : > { %s953_s16 = smov %s955_s5  ;;  %20 = sbr.rel (!%p18_p12) target bundleno = 10 (0xa), region = 92 }
  0x81   :  { %341 = vsyncpa [#allocation3], 1 }
  0x82   :  { %343 = vsyncpa [#allocation3 + $0x1], 1 }
  0x83   :  { %344 = vsyncpa [#allocation4], 1 }
  0x84   :  { %346 = vsyncpa [#allocation4 + $0x1], 1 }
  0x85   :  { %347 = vsyncpa [#allocation5], 1 }
  0x86   :  { %349 = vsyncpa [#allocation5 + $0x1], 1 }
  0x87   :  { %350 = vsyncpa [#allocation6], 1 }
  0x88   :  { %352 = vsyncpa [#allocation6 + $0x1], 1 }

</bundles_post_ra>
